<compile_context>
chip_gen: v6e
topology: v6e:2x2x1
jax: 0.10.0
libtpu: 0.0.40
codegen_flags: <defaults>
</compile_context>

<pallas_src>
import jax
import jax.numpy as jnp
from jax.experimental import pallas as pl
from jax.experimental.pallas import tpu as pltpu

INPUT_DIM = 8                                      # H = W = 8
OUT_CHANNEL = 2
KH = KW = 3
STRIDE = 2
PAD = 1
OH = OW = (INPUT_DIM + 2 * PAD - KH) // STRIDE + 1    # 4
M_OUT = OUT_CHANNEL * OH * OW                         # 32 flattened features
XP_H = INPUT_DIM + PAD                                # 9 padded rows/cols (only top/left pad read)
N_EVEN = (XP_H + 1) // 2                              # 5 even padded columns {0,2,4,6,8}
N_ODD = XP_H // 2                                     # 4 odd  padded columns {1,3,5,7}
ROWS_EVEN = XP_H * N_EVEN                             # 45 even-column rows in the flat slab
ROWS_IN = ROWS_EVEN + XP_H * N_ODD                    # 81 total input rows per sample
LANE = 128

# The even/odd split and top/left-only padding are hard-wired to this conv config.
assert (INPUT_DIM, KH, KW, STRIDE, PAD) == (8, 3, 3, 2, 1)


# ------------------------------- Pallas kernel --------------------------------
def _conv_vpu_kernel(wb_ref, x_ref, out_ref):
    """VPU conv over one batch tile (batch on the 128-lane axis).

    wb_ref : (8, 10)  f32 VMEM  -- wb[c*4 + s, k] = weight[c, k] for k < 9; wb[:, 9] = bias[c]
    x_ref  : (81, TN) f32 VMEM  -- rows 5*r + j    = xpad[r, 2*j]     (even padded cols)
                                   rows 45 + 4*r+j = xpad[r, 2*j + 1] (odd  padded cols)
    out_ref: (32, TN) f32 VMEM  -- out[c*16 + oh*4 + ow, n]  (lane-dense in n)
    """
    # Hoisted: 9 per-tap weight columns + bias column, each (8, 1); reused by all 4 oh rows.
    wcol = [wb_ref[:, k:k + 1] for k in range(KH * KW)]
    bcol = wb_ref[:, KH * KW:KH * KW + 1]

    for oh in range(OH):
        acc = None                                              # (8, TN): ch0 rows 0..3, ch1 rows 4..7
        for kh in range(KH):
            r = STRIDE * oh + kh                                # padded-image row, 0..8 (static)
            starts = (N_EVEN * r,                               # kw=0 -> even cols 0,2,4,6
                      ROWS_EVEN + N_ODD * r,                    # kw=1 -> odd  cols 1,3,5,7
                      N_EVEN * r + 1)                           # kw=2 -> even cols 2,4,6,8
            for kw in range(KW):
                t = x_ref[pl.ds(starts[kw], OW), :]             # (4, TN) contiguous sublane slice
                tp = jnp.concatenate([t, t], axis=0)            # (8, TN) channel-packed (XLU)
                term = tp * wcol[kh * KW + kw]                  # one full-vreg VPU mul per tap
                acc = term if acc is None else acc + term
        acc = acc + bcol
        out_ref[pl.ds(oh * OW, OW), :] = acc[:OW, :]            # channel 0 rows [oh*4, oh*4+4)
        out_ref[pl.ds(OH * OW + oh * OW, OW), :] = acc[OW:, :]  # channel 1 rows [16+oh*4, ...)


# --------------------------------- wrapper -------------------------------------
def _lane_tile_params(n):
    """Pick (tn, n_pad, vmem_limit): lane tiles are multiples of 128, big enough to
    amortize per-step overhead, small enough for v7x's 64 MiB VMEM, and split into
    >= 2 grid steps when possible so both v7x TensorCores get work."""
    try:
        vmem_cap = pltpu.get_tpu_info().vmem_capacity_bytes
    except Exception:
        vmem_cap = 64 << 20                         # be conservative (v7x-sized)
    big_vmem = vmem_cap >= (96 << 20)               # v5e/v6e: 128 MiB; v7x: 64 MiB per TC
    max_tn = 32768 if big_vmem else 16384
    vmem_limit = (64 << 20) if big_vmem else (48 << 20)

    n128 = -(-n // LANE) * LANE                     # round batch up to a full lane group
    if n128 > max_tn:
        tn = max_tn
    elif n128 >= 2 * LANE:
        tn = (n128 // 2 // LANE) * LANE             # >= 2 "parallel" steps (megacore sharding)
    else:
        tn = LANE
    n_pad = -(-n128 // tn) * tn
    return tn, n_pad, vmem_limit


def _build_input(x_nchw, n_pad):
    """(N,1,8,8) -> lane-dense (81, n_pad) slab: 45 even-column rows then 36 odd-column rows
    of the top/left zero-padded 9x9 image (bottom/right pad is never read by this conv)."""
    n = x_nchw.shape[0]
    x = x_nchw.reshape(n, INPUT_DIM, INPUT_DIM).astype(jnp.float32)
    xpad = jnp.pad(x, ((0, 0), (PAD, 0), (PAD, 0)))                 # (N, 9, 9)
    xe = xpad[:, :, 0::2].reshape(n, ROWS_EVEN)                     # (N, 45)
    xo = xpad[:, :, 1::2].reshape(n, ROWS_IN - ROWS_EVEN)           # (N, 36)
    flat = jnp.concatenate([xe, xo], axis=1)                        # (N, 81)
    if n_pad != n:
        flat = jnp.pad(flat, ((0, n_pad - n), (0, 0)))
    return flat.T                                                   # (81, n_pad)


def linear_cnn_forward(x_nchw, weight, bias):
    """x: (N,1,8,8)  weight: (2,1,3,3)  bias: (2,)  ->  (N, 32) (PyTorch flatten order)."""
    n = x_nchw.shape[0]
    tn, n_pad, vmem_limit = _lane_tile_params(n)

    x_flat = _build_input(x_nchw, n_pad)                                        # (81, n_pad)
    w2d = weight.reshape(OUT_CHANNEL, KH * KW).astype(jnp.float32)              # (2, 9)
    b1d = bias.reshape(OUT_CHANNEL).astype(jnp.float32)                         # (2,)
    # Channel-packed (8, 10) weight+bias slab: rows 0..3 -> channel 0, rows 4..7 -> channel 1.
    wb = jnp.concatenate([jnp.repeat(w2d, OW, axis=0),
                          jnp.repeat(b1d, OW)[:, None]], axis=1)                # (8, 10)

    out_cm = pl.pallas_call(
        _conv_vpu_kernel,
        out_shape=jax.ShapeDtypeStruct((M_OUT, n_pad), jnp.float32),
        grid=(n_pad // tn,),
        in_specs=[
            pl.BlockSpec((OUT_CHANNEL * OW, KH * KW + 1), lambda i: (0, 0)),    # weights + bias
            pl.BlockSpec((ROWS_IN, tn), lambda i: (0, i)),                      # (81, tn) input slab
        ],
        out_specs=pl.BlockSpec((M_OUT, tn), lambda i: (0, i)),
        compiler_params=pltpu.CompilerParams(
            dimension_semantics=("parallel",),
            vmem_limit_bytes=vmem_limit,
        ),
    )(wb, x_flat)                                                               # (32, n_pad)

    # TODO(synk): keep the feature-major (32, N) slab if the consumer is a matmul and fold
    # this transpose into its dimension numbers instead of materializing it.
    return out_cm[:, :n].T


# ----------------------------------- main ---------------------------------------
if __name__ == "__main__":
    key = jax.random.PRNGKey(0)
    kx, kw_key, kb_key = jax.random.split(key, 3)

    # Deterministic parameter init (shapes from nn.Conv2d(1, 2, 3, stride=2, padding=1)).
    fan_in = 1 * KH * KW
    bound = fan_in ** -0.5
    weight = jax.random.uniform(kw_key, (OUT_CHANNEL, 1, KH, KW),
                                minval=-bound, maxval=bound, dtype=jnp.float32)
    bias = jax.random.uniform(kb_key, (OUT_CHANNEL,),
                              minval=-bound, maxval=bound, dtype=jnp.float32)

    # Input: batch=2, channels=1, spatial=8 (input_dim=8 in the module).
    x = jax.random.normal(kx, (2, 1, INPUT_DIM, INPUT_DIM), dtype=jnp.float32)

    out = jax.block_until_ready(linear_cnn_forward(x, weight, bias))

    # Cross-check against XLA's conv (reference semantics of the PyTorch module).
    ref_conv = jax.lax.conv_general_dilated(
        x, weight, window_strides=(STRIDE, STRIDE),
        padding=((PAD, PAD), (PAD, PAD)),
        dimension_numbers=("NCHW", "OIHW", "NCHW"),
    ) + bias.reshape(1, OUT_CHANNEL, 1, 1)
    ref = ref_conv.reshape(x.shape[0], M_OUT)

    assert out.shape == (2, M_OUT), out.shape
    assert jnp.allclose(out, ref, atol=1e-5, rtol=1e-5), "mismatch vs reference conv"

    print("KERNEL_OK")
</pallas_src>

<mosaic_0001>
module attributes {stable_mosaic.version = 11 : i64} {
  func.func @_conv_vpu_kernel(%arg0: i32, %arg1: memref<8x10xf32, #tpu.memory_space<vmem>>, %arg2: memref<81x128xf32, #tpu.memory_space<vmem>>, %arg3: memref<32x128xf32, #tpu.memory_space<vmem>>) attributes {dimension_semantics = [#tpu.dimension_semantics<parallel>], iteration_bounds = array<i64: 1>, scalar_prefetch = 0 : i64, scratch_operands = 0 : i64, tpu.core_type = #tpu.core_type<tc>, window_params = [{pipeline_mode = #tpu.pipeline_mode<synchronous>, transform_indices = @transform_0, window_bounds = array<i64: 8, 10>}, {transform_indices = @transform_1, window_bounds = array<i64: 81, 128>}, {transform_indices = @transform_2, window_bounds = array<i64: 32, 128>}]} {
    %c0 = arith.constant 0 : index
    %c0_0 = arith.constant 0 : index
    %0 = vector.load %arg1[%c0, %c0_0] : memref<8x10xf32, #tpu.memory_space<vmem>>, vector<8x1xf32>
    %c0_1 = arith.constant 0 : index
    %c1 = arith.constant 1 : index
    %1 = vector.load %arg1[%c0_1, %c1] : memref<8x10xf32, #tpu.memory_space<vmem>>, vector<8x1xf32>
    %c0_2 = arith.constant 0 : index
    %c2 = arith.constant 2 : index
    %2 = vector.load %arg1[%c0_2, %c2] : memref<8x10xf32, #tpu.memory_space<vmem>>, vector<8x1xf32>
    %c0_3 = arith.constant 0 : index
    %c3 = arith.constant 3 : index
    %3 = vector.load %arg1[%c0_3, %c3] : memref<8x10xf32, #tpu.memory_space<vmem>>, vector<8x1xf32>
    %c0_4 = arith.constant 0 : index
    %c4 = arith.constant 4 : index
    %4 = vector.load %arg1[%c0_4, %c4] : memref<8x10xf32, #tpu.memory_space<vmem>>, vector<8x1xf32>
    %c0_5 = arith.constant 0 : index
    %c5 = arith.constant 5 : index
    %5 = vector.load %arg1[%c0_5, %c5] : memref<8x10xf32, #tpu.memory_space<vmem>>, vector<8x1xf32>
    %c0_6 = arith.constant 0 : index
    %c6 = arith.constant 6 : index
    %6 = vector.load %arg1[%c0_6, %c6] : memref<8x10xf32, #tpu.memory_space<vmem>>, vector<8x1xf32>
    %c0_7 = arith.constant 0 : index
    %c7 = arith.constant 7 : index
    %7 = vector.load %arg1[%c0_7, %c7] : memref<8x10xf32, #tpu.memory_space<vmem>>, vector<8x1xf32>
    %c0_8 = arith.constant 0 : index
    %c8 = arith.constant 8 : index
    %8 = vector.load %arg1[%c0_8, %c8] : memref<8x10xf32, #tpu.memory_space<vmem>>, vector<8x1xf32>
    %c0_9 = arith.constant 0 : index
    %c9 = arith.constant 9 : index
    %9 = vector.load %arg1[%c0_9, %c9] : memref<8x10xf32, #tpu.memory_space<vmem>>, vector<8x1xf32>
    %c0_10 = arith.constant 0 : index
    %c0_11 = arith.constant 0 : index
    %10 = vector.load %arg2[%c0_10, %c0_11] : memref<81x128xf32, #tpu.memory_space<vmem>>, vector<4x128xf32>
    %11 = tpu.concatenate %10, %10 in 0 : vector<4x128xf32>, vector<4x128xf32> -> vector<8x128xf32>
    %12 = vector.broadcast %0 : vector<8x1xf32> to vector<8x128xf32>
    %13 = arith.mulf %11, %12 : vector<8x128xf32>
    %c45 = arith.constant 45 : index
    %c0_12 = arith.constant 0 : index
    %14 = vector.load %arg2[%c45, %c0_12] : memref<81x128xf32, #tpu.memory_space<vmem>>, vector<4x128xf32>
    %15 = tpu.concatenate %14, %14 in 0 : vector<4x128xf32>, vector<4x128xf32> -> vector<8x128xf32>
    %16 = vector.broadcast %1 : vector<8x1xf32> to vector<8x128xf32>
    %17 = arith.mulf %15, %16 : vector<8x128xf32>
    %18 = arith.addf %13, %17 : vector<8x128xf32>
    %c1_13 = arith.constant 1 : index
    %c0_14 = arith.constant 0 : index
    %19 = vector.load %arg2[%c1_13, %c0_14] : memref<81x128xf32, #tpu.memory_space<vmem>>, vector<4x128xf32>
    %20 = tpu.concatenate %19, %19 in 0 : vector<4x128xf32>, vector<4x128xf32> -> vector<8x128xf32>
    %21 = vector.broadcast %2 : vector<8x1xf32> to vector<8x128xf32>
    %22 = arith.mulf %20, %21 : vector<8x128xf32>
    %23 = arith.addf %18, %22 : vector<8x128xf32>
    %c5_15 = arith.constant 5 : index
    %c0_16 = arith.constant 0 : index
    %24 = vector.load %arg2[%c5_15, %c0_16] : memref<81x128xf32, #tpu.memory_space<vmem>>, vector<4x128xf32>
    %25 = tpu.concatenate %24, %24 in 0 : vector<4x128xf32>, vector<4x128xf32> -> vector<8x128xf32>
    %26 = vector.broadcast %3 : vector<8x1xf32> to vector<8x128xf32>
    %27 = arith.mulf %25, %26 : vector<8x128xf32>
    %28 = arith.addf %23, %27 : vector<8x128xf32>
    %c49 = arith.constant 49 : index
    %c0_17 = arith.constant 0 : index
    %29 = vector.load %arg2[%c49, %c0_17] : memref<81x128xf32, #tpu.memory_space<vmem>>, vector<4x128xf32>
    %30 = tpu.concatenate %29, %29 in 0 : vector<4x128xf32>, vector<4x128xf32> -> vector<8x128xf32>
    %31 = vector.broadcast %4 : vector<8x1xf32> to vector<8x128xf32>
    %32 = arith.mulf %30, %31 : vector<8x128xf32>
    %33 = arith.addf %28, %32 : vector<8x128xf32>
    %c6_18 = arith.constant 6 : index
    %c0_19 = arith.constant 0 : index
    %34 = vector.load %arg2[%c6_18, %c0_19] : memref<81x128xf32, #tpu.memory_space<vmem>>, vector<4x128xf32>
    %35 = tpu.concatenate %34, %34 in 0 : vector<4x128xf32>, vector<4x128xf32> -> vector<8x128xf32>
    %36 = vector.broadcast %5 : vector<8x1xf32> to vector<8x128xf32>
    %37 = arith.mulf %35, %36 : vector<8x128xf32>
    %38 = arith.addf %33, %37 : vector<8x128xf32>
    %c10 = arith.constant 10 : index
    %c0_20 = arith.constant 0 : index
    %39 = vector.load %arg2[%c10, %c0_20] : memref<81x128xf32, #tpu.memory_space<vmem>>, vector<4x128xf32>
    %40 = tpu.concatenate %39, %39 in 0 : vector<4x128xf32>, vector<4x128xf32> -> vector<8x128xf32>
    %41 = vector.broadcast %6 : vector<8x1xf32> to vector<8x128xf32>
    %42 = arith.mulf %40, %41 : vector<8x128xf32>
    %43 = arith.addf %38, %42 : vector<8x128xf32>
    %c53 = arith.constant 53 : index
    %c0_21 = arith.constant 0 : index
    %44 = vector.load %arg2[%c53, %c0_21] : memref<81x128xf32, #tpu.memory_space<vmem>>, vector<4x128xf32>
    %45 = tpu.concatenate %44, %44 in 0 : vector<4x128xf32>, vector<4x128xf32> -> vector<8x128xf32>
    %46 = vector.broadcast %7 : vector<8x1xf32> to vector<8x128xf32>
    %47 = arith.mulf %45, %46 : vector<8x128xf32>
    %48 = arith.addf %43, %47 : vector<8x128xf32>
    %c11 = arith.constant 11 : index
    %c0_22 = arith.constant 0 : index
    %49 = vector.load %arg2[%c11, %c0_22] : memref<81x128xf32, #tpu.memory_space<vmem>>, vector<4x128xf32>
    %50 = tpu.concatenate %49, %49 in 0 : vector<4x128xf32>, vector<4x128xf32> -> vector<8x128xf32>
    %51 = vector.broadcast %8 : vector<8x1xf32> to vector<8x128xf32>
    %52 = arith.mulf %50, %51 : vector<8x128xf32>
    %53 = arith.addf %48, %52 : vector<8x128xf32>
    %54 = vector.broadcast %9 : vector<8x1xf32> to vector<8x128xf32>
    %55 = arith.addf %53, %54 : vector<8x128xf32>
    %56 = vector.extract_strided_slice %55 {offsets = [0, 0], sizes = [4, 128], strides = [1, 1]} : vector<8x128xf32> to vector<4x128xf32>
    %c0_23 = arith.constant 0 : index
    %c0_24 = arith.constant 0 : index
    %57 = vector.load %arg3[%c0_23, %c0_24] : memref<32x128xf32, #tpu.memory_space<vmem>>, vector<4x128xf32>
    tpu.vector_store %arg3[%c0_23, %c0_24], %56 {strides = array<i32>} : memref<32x128xf32, #tpu.memory_space<vmem>>, vector<4x128xf32>,
    %58 = vector.extract_strided_slice %55 {offsets = [4, 0], sizes = [4, 128], strides = [1, 1]} : vector<8x128xf32> to vector<4x128xf32>
    %c16 = arith.constant 16 : index
    %c0_25 = arith.constant 0 : index
    %59 = vector.load %arg3[%c16, %c0_25] : memref<32x128xf32, #tpu.memory_space<vmem>>, vector<4x128xf32>
    tpu.vector_store %arg3[%c16, %c0_25], %58 {strides = array<i32>} : memref<32x128xf32, #tpu.memory_space<vmem>>, vector<4x128xf32>,
    %c10_26 = arith.constant 10 : index
    %c0_27 = arith.constant 0 : index
    %60 = vector.load %arg2[%c10_26, %c0_27] : memref<81x128xf32, #tpu.memory_space<vmem>>, vector<4x128xf32>
    %61 = tpu.concatenate %60, %60 in 0 : vector<4x128xf32>, vector<4x128xf32> -> vector<8x128xf32>
    %62 = vector.broadcast %0 : vector<8x1xf32> to vector<8x128xf32>
    %63 = arith.mulf %61, %62 : vector<8x128xf32>
    %c53_28 = arith.constant 53 : index
    %c0_29 = arith.constant 0 : index
    %64 = vector.load %arg2[%c53_28, %c0_29] : memref<81x128xf32, #tpu.memory_space<vmem>>, vector<4x128xf32>
    %65 = tpu.concatenate %64, %64 in 0 : vector<4x128xf32>, vector<4x128xf32> -> vector<8x128xf32>
    %66 = vector.broadcast %1 : vector<8x1xf32> to vector<8x128xf32>
    %67 = arith.mulf %65, %66 : vector<8x128xf32>
    %68 = arith.addf %63, %67 : vector<8x128xf32>
    %c11_30 = arith.constant 11 : index
    %c0_31 = arith.constant 0 : index
    %69 = vector.load %arg2[%c11_30, %c0_31] : memref<81x128xf32, #tpu.memory_space<vmem>>, vector<4x128xf32>
    %70 = tpu.concatenate %69, %69 in 0 : vector<4x128xf32>, vector<4x128xf32> -> vector<8x128xf32>
    %71 = vector.broadcast %2 : vector<8x1xf32> to vector<8x128xf32>
    %72 = arith.mulf %70, %71 : vector<8x128xf32>
    %73 = arith.addf %68, %72 : vector<8x128xf32>
    %c15 = arith.constant 15 : index
    %c0_32 = arith.constant 0 : index
    %74 = vector.load %arg2[%c15, %c0_32] : memref<81x128xf32, #tpu.memory_space<vmem>>, vector<4x128xf32>
    %75 = tpu.concatenate %74, %74 in 0 : vector<4x128xf32>, vector<4x128xf32> -> vector<8x128xf32>
    %76 = vector.broadcast %3 : vector<8x1xf32> to vector<8x128xf32>
    %77 = arith.mulf %75, %76 : vector<8x128xf32>
    %78 = arith.addf %73, %77 : vector<8x128xf32>
    %c57 = arith.constant 57 : index
    %c0_33 = arith.constant 0 : index
    %79 = vector.load %arg2[%c57, %c0_33] : memref<81x128xf32, #tpu.memory_space<vmem>>, vector<4x128xf32>
    %80 = tpu.concatenate %79, %79 in 0 : vector<4x128xf32>, vector<4x128xf32> -> vector<8x128xf32>
    %81 = vector.broadcast %4 : vector<8x1xf32> to vector<8x128xf32>
    %82 = arith.mulf %80, %81 : vector<8x128xf32>
    %83 = arith.addf %78, %82 : vector<8x128xf32>
    %c16_34 = arith.constant 16 : index
    %c0_35 = arith.constant 0 : index
    %84 = vector.load %arg2[%c16_34, %c0_35] : memref<81x128xf32, #tpu.memory_space<vmem>>, vector<4x128xf32>
    %85 = tpu.concatenate %84, %84 in 0 : vector<4x128xf32>, vector<4x128xf32> -> vector<8x128xf32>
    %86 = vector.broadcast %5 : vector<8x1xf32> to vector<8x128xf32>
    %87 = arith.mulf %85, %86 : vector<8x128xf32>
    %88 = arith.addf %83, %87 : vector<8x128xf32>
    %c20 = arith.constant 20 : index
    %c0_36 = arith.constant 0 : index
    %89 = vector.load %arg2[%c20, %c0_36] : memref<81x128xf32, #tpu.memory_space<vmem>>, vector<4x128xf32>
    %90 = tpu.concatenate %89, %89 in 0 : vector<4x128xf32>, vector<4x128xf32> -> vector<8x128xf32>
    %91 = vector.broadcast %6 : vector<8x1xf32> to vector<8x128xf32>
    %92 = arith.mulf %90, %91 : vector<8x128xf32>
    %93 = arith.addf %88, %92 : vector<8x128xf32>
    %c61 = arith.constant 61 : index
    %c0_37 = arith.constant 0 : index
    %94 = vector.load %arg2[%c61, %c0_37] : memref<81x128xf32, #tpu.memory_space<vmem>>, vector<4x128xf32>
    %95 = tpu.concatenate %94, %94 in 0 : vector<4x128xf32>, vector<4x128xf32> -> vector<8x128xf32>
    %96 = vector.broadcast %7 : vector<8x1xf32> to vector<8x128xf32>
    %97 = arith.mulf %95, %96 : vector<8x128xf32>
    %98 = arith.addf %93, %97 : vector<8x128xf32>
    %c21 = arith.constant 21 : index
    %c0_38 = arith.constant 0 : index
    %99 = vector.load %arg2[%c21, %c0_38] : memref<81x128xf32, #tpu.memory_space<vmem>>, vector<4x128xf32>
    %100 = tpu.concatenate %99, %99 in 0 : vector<4x128xf32>, vector<4x128xf32> -> vector<8x128xf32>
    %101 = vector.broadcast %8 : vector<8x1xf32> to vector<8x128xf32>
    %102 = arith.mulf %100, %101 : vector<8x128xf32>
    %103 = arith.addf %98, %102 : vector<8x128xf32>
    %104 = vector.broadcast %9 : vector<8x1xf32> to vector<8x128xf32>
    %105 = arith.addf %103, %104 : vector<8x128xf32>
    %106 = vector.extract_strided_slice %105 {offsets = [0, 0], sizes = [4, 128], strides = [1, 1]} : vector<8x128xf32> to vector<4x128xf32>
    %c4_39 = arith.constant 4 : index
    %c0_40 = arith.constant 0 : index
    %107 = vector.load %arg3[%c4_39, %c0_40] : memref<32x128xf32, #tpu.memory_space<vmem>>, vector<4x128xf32>
    tpu.vector_store %arg3[%c4_39, %c0_40], %106 {strides = array<i32>} : memref<32x128xf32, #tpu.memory_space<vmem>>, vector<4x128xf32>,
    %108 = vector.extract_strided_slice %105 {offsets = [4, 0], sizes = [4, 128], strides = [1, 1]} : vector<8x128xf32> to vector<4x128xf32>
    %c20_41 = arith.constant 20 : index
    %c0_42 = arith.constant 0 : index
    %109 = vector.load %arg3[%c20_41, %c0_42] : memref<32x128xf32, #tpu.memory_space<vmem>>, vector<4x128xf32>
    tpu.vector_store %arg3[%c20_41, %c0_42], %108 {strides = array<i32>} : memref<32x128xf32, #tpu.memory_space<vmem>>, vector<4x128xf32>,
    %c20_43 = arith.constant 20 : index
    %c0_44 = arith.constant 0 : index
    %110 = vector.load %arg2[%c20_43, %c0_44] : memref<81x128xf32, #tpu.memory_space<vmem>>, vector<4x128xf32>
    %111 = tpu.concatenate %110, %110 in 0 : vector<4x128xf32>, vector<4x128xf32> -> vector<8x128xf32>
    %112 = vector.broadcast %0 : vector<8x1xf32> to vector<8x128xf32>
    %113 = arith.mulf %111, %112 : vector<8x128xf32>
    %c61_45 = arith.constant 61 : index
    %c0_46 = arith.constant 0 : index
    %114 = vector.load %arg2[%c61_45, %c0_46] : memref<81x128xf32, #tpu.memory_space<vmem>>, vector<4x128xf32>
    %115 = tpu.concatenate %114, %114 in 0 : vector<4x128xf32>, vector<4x128xf32> -> vector<8x128xf32>
    %116 = vector.broadcast %1 : vector<8x1xf32> to vector<8x128xf32>
    %117 = arith.mulf %115, %116 : vector<8x128xf32>
    %118 = arith.addf %113, %117 : vector<8x128xf32>
    %c21_47 = arith.constant 21 : index
    %c0_48 = arith.constant 0 : index
    %119 = vector.load %arg2[%c21_47, %c0_48] : memref<81x128xf32, #tpu.memory_space<vmem>>, vector<4x128xf32>
    %120 = tpu.concatenate %119, %119 in 0 : vector<4x128xf32>, vector<4x128xf32> -> vector<8x128xf32>
    %121 = vector.broadcast %2 : vector<8x1xf32> to vector<8x128xf32>
    %122 = arith.mulf %120, %121 : vector<8x128xf32>
    %123 = arith.addf %118, %122 : vector<8x128xf32>
    %c25 = arith.constant 25 : index
    %c0_49 = arith.constant 0 : index
    %124 = vector.load %arg2[%c25, %c0_49] : memref<81x128xf32, #tpu.memory_space<vmem>>, vector<4x128xf32>
    %125 = tpu.concatenate %124, %124 in 0 : vector<4x128xf32>, vector<4x128xf32> -> vector<8x128xf32>
    %126 = vector.broadcast %3 : vector<8x1xf32> to vector<8x128xf32>
    %127 = arith.mulf %125, %126 : vector<8x128xf32>
    %128 = arith.addf %123, %127 : vector<8x128xf32>
    %c65 = arith.constant 65 : index
    %c0_50 = arith.constant 0 : index
    %129 = vector.load %arg2[%c65, %c0_50] : memref<81x128xf32, #tpu.memory_space<vmem>>, vector<4x128xf32>
    %130 = tpu.concatenate %129, %129 in 0 : vector<4x128xf32>, vector<4x128xf32> -> vector<8x128xf32>
    %131 = vector.broadcast %4 : vector<8x1xf32> to vector<8x128xf32>
    %132 = arith.mulf %130, %131 : vector<8x128xf32>
    %133 = arith.addf %128, %132 : vector<8x128xf32>
    %c26 = arith.constant 26 : index
    %c0_51 = arith.constant 0 : index
    %134 = vector.load %arg2[%c26, %c0_51] : memref<81x128xf32, #tpu.memory_space<vmem>>, vector<4x128xf32>
    %135 = tpu.concatenate %134, %134 in 0 : vector<4x128xf32>, vector<4x128xf32> -> vector<8x128xf32>
    %136 = vector.broadcast %5 : vector<8x1xf32> to vector<8x128xf32>
    %137 = arith.mulf %135, %136 : vector<8x128xf32>
    %138 = arith.addf %133, %137 : vector<8x128xf32>
    %c30 = arith.constant 30 : index
    %c0_52 = arith.constant 0 : index
    %139 = vector.load %arg2[%c30, %c0_52] : memref<81x128xf32, #tpu.memory_space<vmem>>, vector<4x128xf32>
    %140 = tpu.concatenate %139, %139 in 0 : vector<4x128xf32>, vector<4x128xf32> -> vector<8x128xf32>
    %141 = vector.broadcast %6 : vector<8x1xf32> to vector<8x128xf32>
    %142 = arith.mulf %140, %141 : vector<8x128xf32>
    %143 = arith.addf %138, %142 : vector<8x128xf32>
    %c69 = arith.constant 69 : index
    %c0_53 = arith.constant 0 : index
    %144 = vector.load %arg2[%c69, %c0_53] : memref<81x128xf32, #tpu.memory_space<vmem>>, vector<4x128xf32>
    %145 = tpu.concatenate %144, %144 in 0 : vector<4x128xf32>, vector<4x128xf32> -> vector<8x128xf32>
    %146 = vector.broadcast %7 : vector<8x1xf32> to vector<8x128xf32>
    %147 = arith.mulf %145, %146 : vector<8x128xf32>
    %148 = arith.addf %143, %147 : vector<8x128xf32>
    %c31 = arith.constant 31 : index
    %c0_54 = arith.constant 0 : index
    %149 = vector.load %arg2[%c31, %c0_54] : memref<81x128xf32, #tpu.memory_space<vmem>>, vector<4x128xf32>
    %150 = tpu.concatenate %149, %149 in 0 : vector<4x128xf32>, vector<4x128xf32> -> vector<8x128xf32>
    %151 = vector.broadcast %8 : vector<8x1xf32> to vector<8x128xf32>
    %152 = arith.mulf %150, %151 : vector<8x128xf32>
    %153 = arith.addf %148, %152 : vector<8x128xf32>
    %154 = vector.broadcast %9 : vector<8x1xf32> to vector<8x128xf32>
    %155 = arith.addf %153, %154 : vector<8x128xf32>
    %156 = vector.extract_strided_slice %155 {offsets = [0, 0], sizes = [4, 128], strides = [1, 1]} : vector<8x128xf32> to vector<4x128xf32>
    %c8_55 = arith.constant 8 : index
    %c0_56 = arith.constant 0 : index
    %157 = vector.load %arg3[%c8_55, %c0_56] : memref<32x128xf32, #tpu.memory_space<vmem>>, vector<4x128xf32>
    tpu.vector_store %arg3[%c8_55, %c0_56], %156 {strides = array<i32>} : memref<32x128xf32, #tpu.memory_space<vmem>>, vector<4x128xf32>,
    %158 = vector.extract_strided_slice %155 {offsets = [4, 0], sizes = [4, 128], strides = [1, 1]} : vector<8x128xf32> to vector<4x128xf32>
    %c24 = arith.constant 24 : index
    %c0_57 = arith.constant 0 : index
    %159 = vector.load %arg3[%c24, %c0_57] : memref<32x128xf32, #tpu.memory_space<vmem>>, vector<4x128xf32>
    tpu.vector_store %arg3[%c24, %c0_57], %158 {strides = array<i32>} : memref<32x128xf32, #tpu.memory_space<vmem>>, vector<4x128xf32>,
    %c30_58 = arith.constant 30 : index
    %c0_59 = arith.constant 0 : index
    %160 = vector.load %arg2[%c30_58, %c0_59] : memref<81x128xf32, #tpu.memory_space<vmem>>, vector<4x128xf32>
    %161 = tpu.concatenate %160, %160 in 0 : vector<4x128xf32>, vector<4x128xf32> -> vector<8x128xf32>
    %162 = vector.broadcast %0 : vector<8x1xf32> to vector<8x128xf32>
    %163 = arith.mulf %161, %162 : vector<8x128xf32>
    %c69_60 = arith.constant 69 : index
    %c0_61 = arith.constant 0 : index
    %164 = vector.load %arg2[%c69_60, %c0_61] : memref<81x128xf32, #tpu.memory_space<vmem>>, vector<4x128xf32>
    %165 = tpu.concatenate %164, %164 in 0 : vector<4x128xf32>, vector<4x128xf32> -> vector<8x128xf32>
    %166 = vector.broadcast %1 : vector<8x1xf32> to vector<8x128xf32>
    %167 = arith.mulf %165, %166 : vector<8x128xf32>
    %168 = arith.addf %163, %167 : vector<8x128xf32>
    %c31_62 = arith.constant 31 : index
    %c0_63 = arith.constant 0 : index
    %169 = vector.load %arg2[%c31_62, %c0_63] : memref<81x128xf32, #tpu.memory_space<vmem>>, vector<4x128xf32>
    %170 = tpu.concatenate %169, %169 in 0 : vector<4x128xf32>, vector<4x128xf32> -> vector<8x128xf32>
    %171 = vector.broadcast %2 : vector<8x1xf32> to vector<8x128xf32>
    %172 = arith.mulf %170, %171 : vector<8x128xf32>
    %173 = arith.addf %168, %172 : vector<8x128xf32>
    %c35 = arith.constant 35 : index
    %c0_64 = arith.constant 0 : index
    %174 = vector.load %arg2[%c35, %c0_64] : memref<81x128xf32, #tpu.memory_space<vmem>>, vector<4x128xf32>
    %175 = tpu.concatenate %174, %174 in 0 : vector<4x128xf32>, vector<4x128xf32> -> vector<8x128xf32>
    %176 = vector.broadcast %3 : vector<8x1xf32> to vector<8x128xf32>
    %177 = arith.mulf %175, %176 : vector<8x128xf32>
    %178 = arith.addf %173, %177 : vector<8x128xf32>
    %c73 = arith.constant 73 : index
    %c0_65 = arith.constant 0 : index
    %179 = vector.load %arg2[%c73, %c0_65] : memref<81x128xf32, #tpu.memory_space<vmem>>, vector<4x128xf32>
    %180 = tpu.concatenate %179, %179 in 0 : vector<4x128xf32>, vector<4x128xf32> -> vector<8x128xf32>
    %181 = vector.broadcast %4 : vector<8x1xf32> to vector<8x128xf32>
    %182 = arith.mulf %180, %181 : vector<8x128xf32>
    %183 = arith.addf %178, %182 : vector<8x128xf32>
    %c36 = arith.constant 36 : index
    %c0_66 = arith.constant 0 : index
    %184 = vector.load %arg2[%c36, %c0_66] : memref<81x128xf32, #tpu.memory_space<vmem>>, vector<4x128xf32>
    %185 = tpu.concatenate %184, %184 in 0 : vector<4x128xf32>, vector<4x128xf32> -> vector<8x128xf32>
    %186 = vector.broadcast %5 : vector<8x1xf32> to vector<8x128xf32>
    %187 = arith.mulf %185, %186 : vector<8x128xf32>
    %188 = arith.addf %183, %187 : vector<8x128xf32>
    %c40 = arith.constant 40 : index
    %c0_67 = arith.constant 0 : index
    %189 = vector.load %arg2[%c40, %c0_67] : memref<81x128xf32, #tpu.memory_space<vmem>>, vector<4x128xf32>
    %190 = tpu.concatenate %189, %189 in 0 : vector<4x128xf32>, vector<4x128xf32> -> vector<8x128xf32>
    %191 = vector.broadcast %6 : vector<8x1xf32> to vector<8x128xf32>
    %192 = arith.mulf %190, %191 : vector<8x128xf32>
    %193 = arith.addf %188, %192 : vector<8x128xf32>
    %c77 = arith.constant 77 : index
    %c0_68 = arith.constant 0 : index
    %194 = vector.load %arg2[%c77, %c0_68] : memref<81x128xf32, #tpu.memory_space<vmem>>, vector<4x128xf32>
    %195 = tpu.concatenate %194, %194 in 0 : vector<4x128xf32>, vector<4x128xf32> -> vector<8x128xf32>
    %196 = vector.broadcast %7 : vector<8x1xf32> to vector<8x128xf32>
    %197 = arith.mulf %195, %196 : vector<8x128xf32>
    %198 = arith.addf %193, %197 : vector<8x128xf32>
    %c41 = arith.constant 41 : index
    %c0_69 = arith.constant 0 : index
    %199 = vector.load %arg2[%c41, %c0_69] : memref<81x128xf32, #tpu.memory_space<vmem>>, vector<4x128xf32>
    %200 = tpu.concatenate %199, %199 in 0 : vector<4x128xf32>, vector<4x128xf32> -> vector<8x128xf32>
    %201 = vector.broadcast %8 : vector<8x1xf32> to vector<8x128xf32>
    %202 = arith.mulf %200, %201 : vector<8x128xf32>
    %203 = arith.addf %198, %202 : vector<8x128xf32>
    %204 = vector.broadcast %9 : vector<8x1xf32> to vector<8x128xf32>
    %205 = arith.addf %203, %204 : vector<8x128xf32>
    %206 = vector.extract_strided_slice %205 {offsets = [0, 0], sizes = [4, 128], strides = [1, 1]} : vector<8x128xf32> to vector<4x128xf32>
    %c12 = arith.constant 12 : index
    %c0_70 = arith.constant 0 : index
    %207 = vector.load %arg3[%c12, %c0_70] : memref<32x128xf32, #tpu.memory_space<vmem>>, vector<4x128xf32>
    tpu.vector_store %arg3[%c12, %c0_70], %206 {strides = array<i32>} : memref<32x128xf32, #tpu.memory_space<vmem>>, vector<4x128xf32>,
    %208 = vector.extract_strided_slice %205 {offsets = [4, 0], sizes = [4, 128], strides = [1, 1]} : vector<8x128xf32> to vector<4x128xf32>
    %c28 = arith.constant 28 : index
    %c0_71 = arith.constant 0 : index
    %209 = vector.load %arg3[%c28, %c0_71] : memref<32x128xf32, #tpu.memory_space<vmem>>, vector<4x128xf32>
    tpu.vector_store %arg3[%c28, %c0_71], %208 {strides = array<i32>} : memref<32x128xf32, #tpu.memory_space<vmem>>, vector<4x128xf32>,
    return
  }
  func.func @transform_0(%arg0: i32) -> (i32, i32) {
    %c0_i32 = arith.constant 0 : i32
    %c0_i32_0 = arith.constant 0 : i32
    %c0_i32_1 = arith.constant 0 : i32
    return %c0_i32, %c0_i32_0 : i32, i32
  }
  func.func @transform_1(%arg0: i32) -> (i32, i32) {
    %c0_i32 = arith.constant 0 : i32
    %c0_i32_0 = arith.constant 0 : i32
    return %c0_i32, %arg0 : i32, i32
  }
  func.func @transform_2(%arg0: i32) -> (i32, i32) {
    %c0_i32 = arith.constant 0 : i32
    %c0_i32_0 = arith.constant 0 : i32
    return %c0_i32, %arg0 : i32, i32
  }
}

</mosaic_0001>

<bundles_post_ra>
// kernel: tpu_custom_call.1
= control target key start
LH: loop header
LB: loop body
LE: loop exit
PB: predicated region body
PF: predicated region fallthrough
CT: control target
= control target key end

     0   :  { %7 = vsyncpa [#allocation3], 0  ;;  %s592_s0 = inlined_call_operand.hbm [shape: f32[8,10], index: 0, kind: input, shape index: {}]   ;;  %s593_s1 = inlined_call_operand.hbm [shape: f32[81,128], index: 1, kind: input, shape index: {}]   ;;  %s594_s2 = inlined_call_operand.hbm [shape: f32[32,128], index: 2, kind: output, shape index: {}]  }
   0x1   :  { %8 = vsyncpa [#allocation6], 0 }
   0x2   :  { %9 = vsyncpa [#allocation4], 0  ;;  %s451_s9 = smov [#allocation2]   ;;  %s452_s11 = smov [#allocation5]  }
   0x3   :  { %s16_s10 = sshll.u32 %s451_s9, 4  ;;  %s25_s12 = sshll.u32 %s452_s11, 4  ;;  %s17_s10 = int_to_ptr.vmem [resolvable:$true] %s16_s10  ;;  %s26_s12 = int_to_ptr.vmem [resolvable:$true] %s25_s12 }
   0x4   :  { %s393_s13 = scalar_lea.vmem %s17_s10, 128  ;;  %p398_p1 = scmp.lt.s32.totalorder %s17_s10, %s17_s10 }
   0x5   :  { %p394_p0 = scmp.ne.s32.totalorder %s17_s10, %s393_s13  ;;  %p399_p2 = scmp.lt.s32.totalorder %s393_s13, %s393_s13 }
   0x7   :  { %p400_p3 = por %p399_p2, %p398_p1 }
   0x9   :  { %p401_p4 = pnand %p400_p3, %p394_p0 }
   0xb   :  { %404 = shalt.err (!%p401_p4)
}
   0xc   :  { %19 = dma.hbm_to_vmem [thread:$0]  %s592_s0, 128, %s17_s10, [#allocation3]  }
   0xd   :  { %s413_s16 = scalar_lea.vmem %s26_s12, 1408  ;;  %p418_p6 = scmp.lt.s32.totalorder %s26_s12, %s26_s12 }
   0xe   :  { %p414_p5 = scmp.ne.s32.totalorder %s26_s12, %s413_s16  ;;  %p419_p7 = scmp.lt.s32.totalorder %s413_s16, %s413_s16 }
  0x10   :  { %p420_p8 = por %p419_p7, %p418_p6 }
  0x12   :  { %p421_p9 = pnand %p420_p8, %p414_p5 }
  0x14   :  { %424 = shalt.err (!%p421_p9)
}
  0x15   :  { %s453_s17 = smov 128   ;;  %s454_s18 = smov 8  }
  0x16   :  { %31 = dma.hbm_to_vmem [thread:$0]  %s593_s1, 1408, %s26_s12, [#allocation6], %s453_s17, %s453_s17, %s454_s18  }
  0x17   :  { %445 = dma.done.wait [#allocation3], 128  }
  0x18   :  { %446 = vsyncadd [#allocation3], 4294967168 }
  0x19   :  { %447 = dma.done.wait [#allocation6], 1408  }
  0x1a   :  { %448 = vsyncadd [#allocation6], 4294965888  ;;  %v455_v0 = vmov 2   ;;  %v456_v1 = vmov 0   ;;  %v38_v2 = vld [vmem:[#allocation2] sm:$0xff]  ;;  %v457_v3 = vmov 3  }
  0x1b   :  { %376 = vset.pattern.permute.xlu1 %v455_v0  ;;  %374 = vset.pattern.permute.xlu0 %v456_v1  ;;  %v458_v4 = vmov 1   ;;  %v459_v5 = vmov 4   ;;  %v460_v6 = vmov 5   ;;  %v461_v7 = vmov 6   ;;  %v62_v11 = vld [vmem:[#allocation5 + $0x1] sm:$0xf] }
  0x1c   :  { %68 = vperm.xlu1 %376, %v38_v2   ;;  %47 = vperm.xlu0 %374, %v38_v2   ;;  %v462_v8 = vmov 8   ;;  %v463_v9 = vmov 7   ;;  %v464_v10 = vmov 9   ;;  %v159_v12 = vld [vmem:[#allocation5 + $0xb] sm:$0xf]  ;;  %vm43_vm0 = vcmask 1043456  }
  0x1d   :  { %v224_v13 = vld [vmem:[#allocation5 + $0x15] sm:$0xf]  ;;  %v289_v14 = vld [vmem:[#allocation5 + $0x1f] sm:$0xf]  ;;  %v146_v16 = vld [vmem:[#allocation5 + $0xa] sm:$0xf] }
  0x1e   :  { %v39_v15 = vld [vmem:[#allocation5] sm:$0xf]  ;;  %v211_v17 = vld [vmem:[#allocation5 + $0x14] sm:$0xf]  ;;  %v64_v19 = vrot.slane %v62_v11, 4  ;;  %v161_v20 = vrot.slane %v159_v12, 4 }
  0x1f   :  { %v276_v18 = vld [vmem:[#allocation5 + $0x1e] sm:$0xf]  ;;  %v226_v21 = vrot.slane %v224_v13, 4  ;;  %v291_v22 = vrot.slane %v289_v14, 4  ;;  %v73_v23 = vld [vmem:[#allocation5 + $0x5] sm:$0xf] }
  0x20   :  { %377 = vset.pattern.permute.xlu1 %v457_v3  ;;  %375 = vset.pattern.permute.xlu0 %v458_v4  ;;  %v166_v24 = vld [vmem:[#allocation5 + $0xf] sm:$0xf]  ;;  %v231_v25 = vld [vmem:[#allocation5 + $0x19] sm:$0xf]  ;;  %v296_v26 = vld [vmem:[#allocation5 + $0x23] sm:$0xf]  ;;  %v491_v40 = vsel %vm43_vm0, %v62_v11, %v64_v19  ;;  %v494_v41 = vsel %vm43_vm0, %v159_v12, %v161_v20 }
  0x21   :  { %79 = vperm.xlu1 %377, %v38_v2   ;;  %57 = vperm.xlu0 %375, %v38_v2   ;;  %v41_v27 = vrot.slane %v39_v15, 4  ;;  %v148_v28 = vrot.slane %v146_v16, 4  ;;  %v213_v29 = vrot.slane %v211_v17, 4  ;;  %v278_v30 = vrot.slane %v276_v18, 4  ;;  %v51_v31 = vld [vmem:[#allocation5 + $0x2d] sm:$0xf] }
  0x22   :  { %v152_v32 = vld [vmem:[#allocation5 + $0x35] sm:$0xf]  ;;  %v217_v33 = vld [vmem:[#allocation5 + $0x3d] sm:$0xf]  ;;  %v282_v34 = vld [vmem:[#allocation5 + $0x45] sm:$0xf]  ;;  %v497_v42 = vsel %vm43_vm0, %v224_v13, %v226_v21  ;;  %v500_v43 = vsel %vm43_vm0, %v289_v14, %v291_v22 }
  0x23   :  { %v75_v35 = vrot.slane %v73_v23, 4  ;;  %v168_v36 = vrot.slane %v166_v24, 4  ;;  %v233_v37 = vrot.slane %v231_v25, 4  ;;  %v298_v38 = vrot.slane %v296_v26, 4  ;;  %v84_v39 = vld [vmem:[#allocation5 + $0x31] sm:$0xf] }
  0x24   :  { %v173_v44 = vld [vmem:[#allocation5 + $0x39] sm:$0xf]  ;;  %v238_v45 = vld [vmem:[#allocation5 + $0x41] sm:$0xf]  ;;  %v303_v46 = vld [vmem:[#allocation5 + $0x49] sm:$0xf]  ;;  %v503_v52 = vsel %vm43_vm0, %v39_v15, %v41_v27  ;;  %v506_v53 = vsel %vm43_vm0, %v146_v16, %v148_v28  ;;  %v509_v54 = vsel %vm43_vm0, %v211_v17, %v213_v29  ;;  %v512_v55 = vsel %vm43_vm0, %v276_v18, %v278_v30 }
  0x25   :  { %378 = vset.pattern.permute.xlu1 %v459_v5  ;;  %379 = vset.pattern.permute.xlu0 %v460_v6  ;;  %v53_v47 = vrot.slane %v51_v31, 4  ;;  %v154_v48 = vrot.slane %v152_v32, 4  ;;  %v219_v49 = vrot.slane %v217_v33, 4  ;;  %v284_v50 = vrot.slane %v282_v34, 4  ;;  %v95_v51 = vld [vmem:[#allocation5 + $0x6] sm:$0xf] }
  0x26   :  { %90 = vperm.xlu1 %378, %v38_v2   ;;  %101 = vperm.xlu0 %379, %v38_v2   ;;  %v180_v56 = vld [vmem:[#allocation5 + $0x10] sm:$0xf]  ;;  %v245_v57 = vld [vmem:[#allocation5 + $0x1a] sm:$0xf]  ;;  %v310_v58 = vld [vmem:[#allocation5 + $0x24] sm:$0xf]  ;;  %v515_v0 = vsel %vm43_vm0, %v73_v23, %v75_v35  ;;  %v518_v1 = vsel %vm43_vm0, %v166_v24, %v168_v36  ;;  %v524_v3 = vsel %vm43_vm0, %v296_v26, %v298_v38 }
  0x27   :  { %v86_v59 = vrot.slane %v84_v39, 4  ;;  %v175_v60 = vrot.slane %v173_v44, 4  ;;  %v240_v61 = vrot.slane %v238_v45, 4  ;;  %v305_v62 = vrot.slane %v303_v46, 4  ;;  %v106_v63 = vld [vmem:[#allocation5 + $0xa] sm:$0xf] }
  0x28   :  { %v187_v4 = vld [vmem:[#allocation5 + $0x14] sm:$0xf]  ;;  %v252_v5 = vld [vmem:[#allocation5 + $0x1e] sm:$0xf]  ;;  %v317_v6 = vld [vmem:[#allocation5 + $0x28] sm:$0xf]  ;;  %v55_v12 = vsel %vm43_vm0, %v51_v31, %v53_v47  ;;  %v156_v13 = vsel %vm43_vm0, %v152_v32, %v154_v48  ;;  %v221_v14 = vsel %vm43_vm0, %v217_v33, %v219_v49  ;;  %v286_v15 = vsel %vm43_vm0, %v282_v34, %v284_v50 }
  0x29   :  { %v128_v11 = vld [vmem:[#allocation5 + $0xb] sm:$0xf]  ;;  %v201_v16 = vld [vmem:[#allocation5 + $0x15] sm:$0xf]  ;;  %v266_v17 = vld [vmem:[#allocation5 + $0x1f] sm:$0xf]  ;;  %v177_v26 = vsel %vm43_vm0, %v173_v44, %v175_v60  ;;  %v242_v27 = vsel %vm43_vm0, %v238_v45, %v240_v61  ;;  %v307_v28 = vsel %vm43_vm0, %v303_v46, %v305_v62 }
  0x2a   :  { %380 = vset.pattern.permute.xlu1 %v461_v7  ;;  %382 = vset.pattern.permute.xlu0 %v462_v8  ;;  %v97_v7 = vrot.slane %v95_v51, 4  ;;  %v182_v8 = vrot.slane %v180_v56, 4  ;;  %v331_v18 = vld [vmem:[#allocation5 + $0x29] sm:$0xf]  ;;  %v108_v19 = vrot.slane %v106_v63, 4  ;;  %v189_v20 = vrot.slane %v187_v4, 4 }
  0x2b   :  { %112 = vperm.xlu1 %380, %v38_v2   ;;  %134 = vperm.xlu0 %382, %v38_v2   ;;  %v254_v21 = vrot.slane %v252_v5, 4  ;;  %v319_v22 = vrot.slane %v317_v6, 4  ;;  %v534_v29 = vld [vmem:[#allocation5 + $0x35] sm:$0xf]  ;;  %v536_v30 = vld [vmem:[#allocation5 + $0x3d] sm:$0xf] }
  0x2c   :  { %v538_v31 = vld [vmem:[#allocation5 + $0x45] sm:$0xf]  ;;  %v540_v32 = vld [vmem:[#allocation5 + $0x4d] sm:$0xf]  ;;  %v130_v33 = vrot.slane %v128_v11, 4  ;;  %v203_v34 = vrot.slane %v201_v16, 4  ;;  %v184_v38 = vsel %vm43_vm0, %v180_v56, %v182_v8  ;;  %v110_v45 = vsel %vm43_vm0, %v106_v63, %v108_v19 }
  0x2d   :  { %v268_v35 = vrot.slane %v266_v17, 4  ;;  %v333_v36 = vrot.slane %v331_v18, 4  ;;  %v191_v46 = vsel %vm43_vm0, %v187_v4, %v189_v20  ;;  %v119_v47 = vrot.slane %v534_v29, 4  ;;  %s465_s0 = smov [#allocation7]  }
  0x2e   :  { %v196_v48 = vrot.slane %v536_v30, 4  ;;  %v256_v49 = vsel %vm43_vm0, %v252_v5, %v254_v21  ;;  %v321_v50 = vsel %vm43_vm0, %v317_v6, %v319_v22  ;;  %v326_v56 = vrot.slane %v540_v32, 4  ;;  %s346_s1 = sshll.u32 %s465_s0, 4  ;;  %s347_s1 = int_to_ptr.vmem [resolvable:$true] %s346_s1 }
  0x2f   :  { %381 = vset.pattern.permute.xlu1 %v463_v9  ;;  %384 = vset.pattern.permute.xlu0 %v464_v10  ;;  %v247_v9 = vrot.slane %v245_v57, 4  ;;  %v205_v60 = vsel %vm43_vm0, %v201_v16, %v203_v34  ;;  %v270_v61 = vsel %vm43_vm0, %v266_v17, %v268_v35  ;;  %v335_v62 = vsel %vm43_vm0, %v331_v18, %v333_v36  ;;  %s425_s21 = scalar_lea.vmem %s347_s1, 512  ;;  %p430_p11 = scmp.lt.s32.totalorder %s347_s1, %s347_s1 }
  0x30   :  { %123 = vperm.xlu1 %381, %v38_v2   ;;  %p426_p10 = scmp.ne.s32.totalorder %s347_s1, %s425_s21  ;;  %p431_p12 = scmp.lt.s32.totalorder %s425_s21, %s425_s21 }
  0x32   :  { %p432_p13 = por %p431_p12, %p430_p11 }
  0x34   :  { %383 = vset.pattern.permute.xlu1 %v464_v10  ;;  %v312_v10 = vrot.slane %v310_v58, 4  ;;  %p433_p0 = pnand %p432_p13, %p426_p10 }
  0x35   :  { %140 = vperm.xlu1 %383, %v38_v2   ;;  %v521_v2 = vsel %vm43_vm0, %v231_v25, %v233_v37  ;;  %v88_v25 = vsel %vm43_vm0, %v84_v39, %v86_v59  ;;  %v99_v37 = vsel %vm43_vm0, %v95_v51, %v97_v7  ;;  %v249_v39 = vsel %vm43_vm0, %v245_v57, %v247_v9 }
  0x36   :  { %v314_v44 = vsel %vm43_vm0, %v310_v58, %v312_v10  ;;  %v261_v51 = vrot.slane %v538_v31, 4  ;;  %v132_v58 = vsel %vm43_vm0, %v128_v11, %v130_v33 }
  0x97   :  { %v69_v23 = vpop.permute.xlu1 %68  ;;  %v48_v24 = vpop.permute.xlu0 %47 }
  0x98   :  { %v50_v63 = vmul.f32 %v48_v24, %v503_v52  ;;  %v151_v4 = vmul.f32 %v506_v53, %v48_v24  ;;  %v216_v5 = vmul.f32 %v509_v54, %v48_v24  ;;  %v281_v6 = vmul.f32 %v512_v55, %v48_v24 }
  0x99   :  { %v71_v11 = vmul.f32 %v69_v23, %v491_v40  ;;  %v164_v16 = vmul.f32 %v494_v41, %v69_v23  ;;  %v229_v17 = vmul.f32 %v497_v42, %v69_v23  ;;  %v294_v18 = vmul.f32 %v500_v43, %v69_v23 }
  0x9c   :  { %v80_v59 = vpop.permute.xlu1 %79  ;;  %v58_v57 = vpop.permute.xlu0 %57 }
  0x9d   :  { %v60_v7 = vmul.f32 %v58_v57, %v55_v12  ;;  %v157_v8 = vmul.f32 %v156_v13, %v58_v57  ;;  %v222_v9 = vmul.f32 %v221_v14, %v58_v57  ;;  %v287_v10 = vmul.f32 %v286_v15, %v58_v57 }
  0x9e   :  { %v82_v54 = vmul.f32 %v80_v59, %v515_v0  ;;  %v171_v55 = vmul.f32 %v518_v1, %v80_v59  ;;  %v236_v12 = vmul.f32 %v521_v2, %v80_v59  ;;  %v301_v13 = vmul.f32 %v524_v3, %v80_v59 }
  0x9f   :  { %v61_v19 = vadd.f32 %v60_v7, %v50_v63  ;;  %v158_v52 = vadd.f32 %v157_v8, %v151_v4  ;;  %v223_v20 = vadd.f32 %v222_v9, %v216_v5  ;;  %v288_v53 = vadd.f32 %v287_v10, %v281_v6 }
  0xa1   :  { %v91_v14 = vpop.permute.xlu1 %90  ;;  %v72_v40 = vadd.f32 %v71_v11, %v61_v19  ;;  %v165_v15 = vadd.f32 %v164_v16, %v158_v52  ;;  %v230_v41 = vadd.f32 %v229_v17, %v223_v20  ;;  %v295_v21 = vadd.f32 %v294_v18, %v288_v53  ;;  %v102_v42 = vpop.permute.xlu0 %101 }
  0xa2   :  { %v93_v22 = vmul.f32 %v91_v14, %v88_v25  ;;  %v178_v43 = vmul.f32 %v177_v26, %v91_v14  ;;  %v243_v23 = vmul.f32 %v242_v27, %v91_v14  ;;  %v308_v24 = vmul.f32 %v307_v28, %v91_v14 }
  0xa3   :  { %v83_v33 = vadd.f32 %v82_v54, %v72_v40  ;;  %v172_v34 = vadd.f32 %v171_v55, %v165_v15  ;;  %v237_v35 = vadd.f32 %v236_v12, %v230_v41  ;;  %v302_v0 = vadd.f32 %v301_v13, %v295_v21 }
  0xa4   :  { %v104_v36 = vmul.f32 %v102_v42, %v99_v37  ;;  %v185_v1 = vmul.f32 %v184_v38, %v102_v42  ;;  %v250_v57 = vmul.f32 %v249_v39, %v102_v42  ;;  %v315_v2 = vmul.f32 %v314_v44, %v102_v42 }
  0xa5   :  { %v94_v63 = vadd.f32 %v93_v22, %v83_v33  ;;  %v179_v3 = vadd.f32 %v178_v43, %v172_v34  ;;  %v244_v59 = vadd.f32 %v243_v23, %v237_v35  ;;  %v309_v4 = vadd.f32 %v308_v24, %v302_v0 }
  0xa6   :  { %v113_v5 = vpop.permute.xlu1 %112  ;;  %v135_v26 = vpop.permute.xlu0 %134  ;;  %v121_v37 = vsel %vm43_vm0, %v534_v29, %v119_v47  ;;  %v198_v38 = vsel %vm43_vm0, %v536_v30, %v196_v48  ;;  %v263_v39 = vsel %vm43_vm0, %v538_v31, %v261_v51  ;;  %v328_v44 = vsel %vm43_vm0, %v540_v32, %v326_v56 }
  0xa7   :  { %v115_v6 = vmul.f32 %v113_v5, %v110_v45  ;;  %v192_v7 = vmul.f32 %v191_v46, %v113_v5  ;;  %v257_v8 = vmul.f32 %v256_v49, %v113_v5  ;;  %v322_v25 = vmul.f32 %v321_v50, %v113_v5 }
  0xa8   :  { %v105_v27 = vadd.f32 %v104_v36, %v94_v63  ;;  %v186_v28 = vadd.f32 %v185_v1, %v179_v3  ;;  %v251_v9 = vadd.f32 %v250_v57, %v244_v59  ;;  %v316_v10 = vadd.f32 %v315_v2, %v309_v4 }
  0xa9   :  { %v137_v45 = vmul.f32 %v135_v26, %v132_v58  ;;  %v206_v46 = vmul.f32 %v205_v60, %v135_v26  ;;  %v271_v49 = vmul.f32 %v270_v61, %v135_v26  ;;  %v336_v50 = vmul.f32 %v335_v62, %v135_v26 }
  0xaa   :  { %v116_v29 = vadd.f32 %v115_v6, %v105_v27  ;;  %v193_v47 = vadd.f32 %v192_v7, %v186_v28  ;;  %v258_v11 = vadd.f32 %v257_v8, %v251_v9  ;;  %v323_v16 = vadd.f32 %v322_v25, %v316_v10 }
  0xab   :  { %v124_v17 = vpop.permute.xlu1 %123 }
  0xac   :  { %v126_v30 = vmul.f32 %v124_v17, %v121_v37  ;;  %v199_v48 = vmul.f32 %v198_v38, %v124_v17  ;;  %v264_v18 = vmul.f32 %v263_v39, %v124_v17  ;;  %v329_v19 = vmul.f32 %v328_v44, %v124_v17 }
  0xae   :  { %v127_v52 = vadd.f32 %v126_v30, %v116_v29  ;;  %v200_v31 = vadd.f32 %v199_v48, %v193_v47  ;;  %v265_v51 = vadd.f32 %v264_v18, %v258_v11  ;;  %v330_v20 = vadd.f32 %v329_v19, %v323_v16 }
  0xb0   :  { %v141_v32 = vpop.permute.xlu1 %140  ;;  %v138_v56 = vadd.f32 %v137_v45, %v127_v52  ;;  %v207_v58 = vadd.f32 %v206_v46, %v200_v31  ;;  %v272_v60 = vadd.f32 %v271_v49, %v265_v51  ;;  %v337_v61 = vadd.f32 %v336_v50, %v330_v20 }
  0xb2   :  { %v143_v62 = vadd.f32 %v141_v32, %v138_v56  ;;  %v208_v53 = vadd.f32 %v207_v58, %v141_v32  ;;  %v273_v54 = vadd.f32 %v272_v60, %v141_v32  ;;  %v338_v55 = vadd.f32 %v337_v61, %v141_v32 }
  0xb4   :  { %144 = vst [vmem:[#allocation7] ss:$16 sps:$4 sm:$0xff] %v143_v62   ;;  %209 = vst [vmem:[#allocation7 + $0x4] ss:$16 sps:$4 sm:$0xff] %v208_v53  }
  0xb5   :  { %274 = vst [vmem:[#allocation7 + $0x8] ss:$16 sps:$4 sm:$0xff] %v273_v54   ;;  %339 = vst [vmem:[#allocation7 + $0xc] ss:$16 sps:$4 sm:$0xff] %v338_v55  }
  0xb6   :  { %436 = shalt.err (!%p433_p0)
}
  0xb7   :  { %352 = dma.vmem_to_hbm [thread:$0]  %s347_s1, 512, %s594_s2, [#allocation4], %s453_s17, %s453_s17, %s454_s18  }
  0xb8   :  { %449 = dma.done.wait [#allocation4], 512  }
  0xb9   :  { %450 = vsyncadd [#allocation4], 4294966784 }
  0xba   :  { %356 = vsyncpa [#allocation3], 1 }
  0xbb   :  { %357 = vsyncpa [#allocation6], 1 }
  0xbc   :  { %358 = vsyncpa [#allocation4], 1 }

</bundles_post_ra>
